<compile_context>
chip_gen: v6e
topology: v6e:2x2x1
jax: 0.10.0
libtpu: 0.0.40
codegen_flags: <defaults>
</compile_context>

<pallas_src>
import functools

import jax
import jax.numpy as jnp
from jax import lax
from jax.experimental import pallas as pl
from jax.experimental.pallas import tpu as pltpu

INPUT_SIZE = 27
HIDDEN_SIZE = 64
OUTPUT_SIZE = 9


def _round_up(n, m):
    return ((n + m - 1) // m) * m


def _choose_tile(batch, block_b):
    """Pick (bb, grid) with pad waste bounded to <128 columns per grid step."""
    if batch <= block_b:
        # Single step: block dims equal the full array dims, so the (8,128)
        # divisibility constraint is satisfied for any batch size.
        return batch, 1
    steps = pl.cdiv(batch, block_b)
    bb = _round_up(pl.cdiv(batch, steps), 128)   # multiple of 128
    # Ragged final block (grid*bb >= batch) is handled by Pallas: OOB input
    # reads are clamped, OOB output writes are discarded; softmax is strictly
    # per-column so garbage columns never mix with real ones.
    return bb, pl.cdiv(batch, bb)


def _policy_kernel(x_ref, w_ref, b_ref, out_ref):
    # x_ref:   (bb, 27)  -- natural batch-major input tile
    # w_ref:   (9, 27)   -- fused effective weight (VMEM-resident)
    # b_ref:   (9, 1)    -- fused effective bias   (VMEM-resident)
    # out_ref: (9, bb)   -- softmax probabilities, batch on the lane axis
    logits = lax.dot_general(
        w_ref[...], x_ref[...],
        dimension_numbers=(((1,), (1,)), ((), ())),   # contract the 27-axis
        preferred_element_type=jnp.float32,
    ) + b_ref[...]
    # Softmax over the feature axis (axis 0 here == torch dim=1), per column.
    m = jnp.max(logits, axis=0, keepdims=True)
    e = jnp.exp(logits - m)
    denom = jnp.sum(e, axis=0, keepdims=True)
    out_ref[...] = (e / denom).astype(out_ref.dtype)   # exact divide


def fuse_policy_params(w1, b1, w2, b2):
    """One-time parameter prep (hoisted out of the per-call forward).

    Linear->Linear with no activation fuses exactly:
      y = (x @ w1.T + b1) @ w2.T + b2 = x @ (w2 @ w1).T + (w2 @ b1 + b2)
    PyTorch layouts: w1 (64, 27), b1 (64,), w2 (9, 64), b2 (9,).
    """
    w_eff = (w2 @ w1).astype(jnp.float32)                               # (9, 27)
    b_eff = (w2 @ b1 + b2).reshape(OUTPUT_SIZE, 1).astype(jnp.float32)  # (9, 1)
    return w_eff, b_eff


@functools.partial(jax.jit, static_argnames=("block_b", "transpose_output"))
def policy_forward(x, w_eff, b_eff, *, block_b=8192, transpose_output=True):
    """x: (B, 27) float32 -> (B, 9) softmax probabilities (torch layout).

    With transpose_output=False the result is returned feature-major (9, B),
    saving the final small transpose for consumers that can use that layout.
    """
    B = x.shape[0]
    bb, grid = _choose_tile(B, block_b)

    cost = pl.CostEstimate(
        flops=2 * B * INPUT_SIZE * OUTPUT_SIZE + 6 * B * OUTPUT_SIZE,
        transcendentals=B * OUTPUT_SIZE,
        bytes_accessed=4 * (B * INPUT_SIZE + B * OUTPUT_SIZE
                            + OUTPUT_SIZE * INPUT_SIZE + OUTPUT_SIZE),
    )

    out_t = pl.pallas_call(
        _policy_kernel,
        out_shape=jax.ShapeDtypeStruct((OUTPUT_SIZE, B), jnp.float32),
        grid=(grid,),
        in_specs=[
            pl.BlockSpec((bb, INPUT_SIZE), lambda i: (i, 0)),           # x tiles (natural layout)
            pl.BlockSpec((OUTPUT_SIZE, INPUT_SIZE), lambda i: (0, 0)),  # W_eff (resident)
            pl.BlockSpec((OUTPUT_SIZE, 1), lambda i: (0, 0)),           # b_eff (resident)
        ],
        out_specs=pl.BlockSpec((OUTPUT_SIZE, bb), lambda i: (0, i)),    # lane-dense output
        compiler_params=pltpu.CompilerParams(
            dimension_semantics=("parallel",),   # megacore sharding on v7x
        ),
        cost_estimate=cost,
    )(x.astype(jnp.float32), w_eff, b_eff)

    return out_t.T if transpose_output else out_t


def _init_params(key):
    """Deterministic init mimicking nn.Linear's uniform(-1/sqrt(fan_in), +)."""
    k1, k2, k3, k4 = jax.random.split(key, 4)
    bound1 = 1.0 / jnp.sqrt(INPUT_SIZE)
    bound2 = 1.0 / jnp.sqrt(HIDDEN_SIZE)
    w1 = jax.random.uniform(k1, (HIDDEN_SIZE, INPUT_SIZE), jnp.float32, -bound1, bound1)
    b1 = jax.random.uniform(k2, (HIDDEN_SIZE,), jnp.float32, -bound1, bound1)
    w2 = jax.random.uniform(k3, (OUTPUT_SIZE, HIDDEN_SIZE), jnp.float32, -bound2, bound2)
    b2 = jax.random.uniform(k4, (OUTPUT_SIZE,), jnp.float32, -bound2, bound2)
    return w1, b1, w2, b2


if __name__ == "__main__":
    key = jax.random.PRNGKey(0)
    k_x, k_p = jax.random.split(key)

    batch = 8
    # TicTacToe state: 27-dim encoding (3 states x 9 cells)
    x = jax.random.uniform(k_x, (batch, INPUT_SIZE), jnp.float32)
    w1, b1, w2, b2 = _init_params(k_p)

    # One-time fused-parameter prep (would be cached in a real serving loop).
    w_eff, b_eff = fuse_policy_params(w1, b1, w2, b2)

    out = policy_forward(x, w_eff, b_eff)
    out = jax.block_until_ready(out)

    # Reference: the unfused two-layer forward, exactly the PyTorch math.
    ref = jax.nn.softmax((x @ w1.T + b1) @ w2.T + b2, axis=1)

    assert out.shape == (batch, OUTPUT_SIZE)
    assert jnp.allclose(out, ref, atol=1e-4, rtol=1e-4), float(jnp.max(jnp.abs(out - ref)))
    # Exact softmax normalization (no approx reciprocal anymore).
    assert jnp.allclose(jnp.sum(out, axis=1), 1.0, atol=1e-5)

    print("KERNEL_OK")
</pallas_src>

<mosaic_0001>
module attributes {stable_mosaic.version = 11 : i64} {
  func.func @_policy_kernel(%arg0: i32, %arg1: memref<8x27xf32, #tpu.memory_space<vmem>>, %arg2: memref<9x27xf32, #tpu.memory_space<vmem>>, %arg3: memref<9x1xf32, #tpu.memory_space<vmem>>, %arg4: memref<9x8xf32, #tpu.memory_space<vmem>>) attributes {dimension_semantics = [#tpu.dimension_semantics<parallel>], iteration_bounds = array<i64: 1>, scalar_prefetch = 0 : i64, scratch_operands = 0 : i64, tpu.core_type = #tpu.core_type<tc>, window_params = [{transform_indices = @transform_0, window_bounds = array<i64: 8, 27>}, {pipeline_mode = #tpu.pipeline_mode<synchronous>, transform_indices = @transform_1, window_bounds = array<i64: 9, 27>}, {pipeline_mode = #tpu.pipeline_mode<synchronous>, transform_indices = @transform_2, window_bounds = array<i64: 9, 1>}, {transform_indices = @transform_3, window_bounds = array<i64: 9, 8>}]} {
    %c0 = arith.constant 0 : index
    %c0_0 = arith.constant 0 : index
    %0 = vector.load %arg2[%c0, %c0_0] : memref<9x27xf32, #tpu.memory_space<vmem>>, vector<9x27xf32>
    %c0_1 = arith.constant 0 : index
    %c0_2 = arith.constant 0 : index
    %1 = vector.load %arg1[%c0_1, %c0_2] : memref<8x27xf32, #tpu.memory_space<vmem>>, vector<8x27xf32>
    %cst = arith.constant dense<0.000000e+00> : vector<9x8xf32>
    %2 = tpu.matmul %0, %1, %cst {dimension_numbers = #tpu.dot_dimension_numbers<[1], [1], [0], [0], [0, 0, 1, 0], [], []>} : vector<9x27xf32>, vector<8x27xf32>, vector<9x8xf32> -> vector<9x8xf32>
    %c0_3 = arith.constant 0 : index
    %c0_4 = arith.constant 0 : index
    %3 = vector.load %arg3[%c0_3, %c0_4] : memref<9x1xf32, #tpu.memory_space<vmem>>, vector<9x1xf32>
    %4 = vector.broadcast %3 : vector<9x1xf32> to vector<9x8xf32>
    %5 = arith.addf %2, %4 : vector<9x8xf32>
    %cst_5 = arith.constant dense<0xFF800000> : vector<8xf32>
    %6 = vector.multi_reduction <maximumf>, %5, %cst_5 [0] : vector<9x8xf32> to vector<8xf32>
    %7 = vector.shape_cast %6 : vector<8xf32> to vector<1x8xf32>
    %8 = vector.broadcast %7 : vector<1x8xf32> to vector<9x8xf32>
    %9 = arith.subf %5, %8 : vector<9x8xf32>
    %10 = math.exp %9 : vector<9x8xf32>
    %cst_6 = arith.constant dense<0.000000e+00> : vector<8xf32>
    %11 = vector.multi_reduction <add>, %10, %cst_6 [0] : vector<9x8xf32> to vector<8xf32>
    %12 = vector.shape_cast %11 : vector<8xf32> to vector<1x8xf32>
    %13 = vector.broadcast %12 : vector<1x8xf32> to vector<9x8xf32>
    %14 = arith.divf %10, %13 : vector<9x8xf32>
    %c0_7 = arith.constant 0 : index
    %c0_8 = arith.constant 0 : index
    %15 = vector.load %arg4[%c0_7, %c0_8] : memref<9x8xf32, #tpu.memory_space<vmem>>, vector<9x8xf32>
    tpu.vector_store %arg4[%c0_7, %c0_8], %14 {strides = array<i32>} : memref<9x8xf32, #tpu.memory_space<vmem>>, vector<9x8xf32>,
    return
  }
  func.func @transform_0(%arg0: i32) -> (i32, i32) {
    %c0_i32 = arith.constant 0 : i32
    %c0_i32_0 = arith.constant 0 : i32
    return %arg0, %c0_i32 : i32, i32
  }
  func.func @transform_1(%arg0: i32) -> (i32, i32) {
    %c0_i32 = arith.constant 0 : i32
    %c0_i32_0 = arith.constant 0 : i32
    %c0_i32_1 = arith.constant 0 : i32
    return %c0_i32, %c0_i32_0 : i32, i32
  }
  func.func @transform_2(%arg0: i32) -> (i32, i32) {
    %c0_i32 = arith.constant 0 : i32
    %c0_i32_0 = arith.constant 0 : i32
    %c0_i32_1 = arith.constant 0 : i32
    return %c0_i32, %c0_i32_0 : i32, i32
  }
  func.func @transform_3(%arg0: i32) -> (i32, i32) {
    %c0_i32 = arith.constant 0 : i32
    %c0_i32_0 = arith.constant 0 : i32
    return %c0_i32, %arg0 : i32, i32
  }
}

</mosaic_0001>

<bundles_post_ra>
// kernel: policy_forward.1
= control target key start
LH: loop header
LB: loop body
LE: loop exit
PB: predicated region body
PF: predicated region fallthrough
CT: control target
= control target key end

     0   :  { %8 = vsyncpa [#allocation3], 0  ;;  %s204_s12 = smov [#allocation2]   ;;  %s253_s0 = inlined_call_operand.hbm [shape: f32[8,27], index: 0, kind: input, shape index: {}]   ;;  %s254_s1 = inlined_call_operand.vmem [shape: f32[9,27], index: 1, kind: input, shape index: {}]   ;;  %s255_s2 = inlined_call_operand.vmem [shape: f32[9,1], index: 2, kind: input, shape index: {}]   ;;  %s256_s3 = inlined_call_operand.vmem [shape: f32[9,8], index: 3, kind: output, shape index: {}]  }
   0x1   :  { %s15_s13 = sshll.u32 %s204_s12, 4  ;;  %s16_s13 = int_to_ptr.vmem [resolvable:$true] %s15_s13 }
   0x2   :  { %s190_s14 = scalar_lea.vmem %s16_s13, 128  ;;  %p195_p1 = scmp.lt.s32.totalorder %s16_s13, %s16_s13 }
   0x3   :  { %p191_p0 = scmp.ne.s32.totalorder %s16_s13, %s190_s14  ;;  %p196_p2 = scmp.lt.s32.totalorder %s190_s14, %s190_s14 }
   0x5   :  { %p197_p3 = por %p196_p2, %p195_p1 }
   0x7   :  { %p198_p4 = pnand %p197_p3, %p191_p0 }
   0x9   :  { %201 = shalt.err (!%p198_p4)
}
   0xa   :  { %18 = dma.hbm_to_vmem [thread:$0]  %s253_s0, 128, %s16_s13, [#allocation3]  }
   0xb   :  { %202 = dma.done.wait [#allocation3], 128  }
   0xc   :  { %203 = vsyncadd [#allocation3], 4294967168  ;;  %v205_v0 = vmov 0   ;;  %vm41_vm0 = vcmask 220160   ;;  %v28_v1 = vld [vmem:[#allocation2] sm:$0xff]  ;;  %vm128_vm1 = vcmask 57344  }
   0xd   :  { %175 = vset.pattern.permute.xlu0 %v205_v0  ;;  %v26_v2 = vld [vmem:[%s254_s1] sm:$0xff]  ;;  %168 = vmatprep.subr.msk.mxu0 %vm41_vm0, %v28_v1  ;;  %v27_v4 = vld [vmem:[%s254_s1 + $0x8] sm:$0x1]  ;;  %vm126_vm2 = vcmask 64512  }
   0xe   :  { %170 = vmatprep.mubr.msk.f32.mxu0 %vm41_vm0, %v26_v2  ;;  %v29_v3 = vld [vmem:[%s255_s2] sm:$0xff]  ;;  %169 = vmatpush3.xpose.msk.msra.mxu0 %vm41_vm0, %v28_v1  ;;  %v30_v5 = vld [vmem:[%s255_s2 + $0x8] sm:$0x1] }
   0xf   :  { %33 = vperm.xlu0 %175, %v29_v3  }
  0x11   :  { %171 = vmatmul.mubr.msk.f32.vlgmr.msra.gmra.mxu0 %vm41_vm0, %v27_v4 }
  0x13   :  { %38 = vperm.xlu0 %175, %v30_v5  }
  0x8a   :  { %v34_v6 = vpop.permute.xlu0 %33 }
  0x8e   :  { %v39_v7 = vpop.permute.xlu0 %38 }
  0xd1   :  { %v172_v8 = vpop.f32.mrf.mxu0 }
  0xd2   :  { %v123_v9 = vadd.f32 %v172_v8, %v39_v7 }
  0xd3   :  { %v117_v10 = vpop.f32.mrf.mxu0 }
  0xd4   :  { %v118_v11 = vadd.f32 %v117_v10, %v34_v6  ;;  %v129_v12 = vsel %vm128_vm1, %v123_v9, -inf }
  0xd6   :  { %v127_v13 = vsel %vm126_vm2, %v118_v11, -inf }
  0xd7   :  { %v130_v14 = vmax.f32 %v127_v13, %v129_v12 }
  0xd9   :  { %v131_v15 = vrot.slane %v130_v14, 4 }
  0xdb   :  { %v132_v16 = vmax.f32 %v130_v14, %v131_v15 }
  0xdd   :  { %v133_v17 = vrot.slane %v132_v16, 2 }
  0xdf   :  { %v134_v18 = vmax.f32 %v132_v16, %v133_v17 }
  0xe1   :  { %v135_v19 = vrot.slane %v134_v18, 1 }
  0xe3   :  { %v136_v20 = vmax.f32 %v134_v18, %v135_v19 }
  0xe5   :  { %v137_v21 = vsub.f32 %v118_v11, %v136_v20  ;;  %v138_v22 = vsub.f32 %v123_v9, %v136_v20 }
  0xe7   :  { %v139_v23 = vmul.f32 1.442695, %v137_v21  ;;  %v141_v24 = vmul.f32 1.442695, %v138_v22 }
  0xe9   :  { %176 = vpow2.f32 %v139_v23 }
  0xea   :  { %178 = vpow2.f32 %v141_v24 }
  0xf6   :  { %v177_v25 = vpop.eup %176 }
  0xf7   :  { %v179_v26 = vpop.eup %178  ;;  %v143_v27 = vsel %vm126_vm2, %v177_v25, 0.0 }
  0xf8   :  { %v144_v28 = vsel %vm128_vm1, %v179_v26, 0.0 }
  0xf9   :  { %v145_v29 = vadd.f32 %v144_v28, %v143_v27 }
  0xfb   :  { %v146_v30 = vrot.slane %v145_v29, 4 }
  0xfd   :  { %v147_v31 = vadd.f32 %v146_v30, %v145_v29 }
  0xff   :  { %v148_v32 = vrot.slane %v147_v31, 2 }
 0x101   :  { %v149_v33 = vadd.f32 %v148_v32, %v147_v31 }
 0x103   :  { %v150_v34 = vrot.slane %v149_v33, 1 }
 0x105   :  { %v151_v35 = vadd.f32 %v150_v34, %v149_v33 }
 0x107   :  { %180 = vrcp.f32 %v151_v35 }
 0x114   :  { %v181_v36 = vpop.eup %180 }
 0x115   :  { %v153_v37 = vmul.f32 %v181_v36, %v177_v25  ;;  %v154_v38 = vmul.f32 %v181_v36, %v179_v26 }
 0x117   :  { %155 = vst.msk [vmem:[%s256_s3] sm:$0xff] %vm126_vm2, %v153_v37 }
 0x118   :  { %156 = vst.msk [vmem:[%s256_s3 + $0x8] sm:$0x1] %vm128_vm1, %v154_v38 }
 0x119   :  { %161 = vsyncpa [#allocation3], 1 }

</bundles_post_ra>
